<compile_context>
chip_gen: v7x
topology: tpu7x:2x2x1
jax: 0.10.0
libtpu: 0.0.40
codegen_flags: <defaults>
</compile_context>

<pallas_src>
import jax
import jax.numpy as jnp
from jax import lax
from jax.experimental import pallas as pl
from jax.experimental.pallas import tpu as pltpu


def cnn_kernel(x_ref, mask_ref, wc_ref, pb_ref, bd_ref, o_ref):
    # x_ref:    (M, H)  bf16   M = B*S flattened into the MXU M dimension
    # mask_ref: (M, 1)  int32  1 = masked position
    # wc_ref:   (H, F)  bf16   conv weight, pre-transposed to (H, F)
    # pb_ref:   (2, F)  f32    row 0 = conv bias, row 1 = dense weight
    # bd_ref:   (1, 1)  f32    dense bias (SMEM scalar)
    # o_ref:    (1, B)  f32    lane-dense output (batch on the lane axis)
    M, H = x_ref.shape
    F = wc_ref.shape[1]
    B = o_ref.shape[1]
    S = M // B

    # masked_fill_(mask, 0): single vselect, (M,1) mask lane-broadcast over H,
    # done directly on the bf16 values (no convert, no extra multiply).
    x = x_ref[...]
    xm = jnp.where(mask_ref[...] == 0, x, jnp.zeros_like(x))

    # Conv2d(1, F, (1, H)) + bias == per-position linear: one MXU matmul.
    conv = jnp.dot(xm, wc_ref[...], preferred_element_type=jnp.float32)
    conv = jnp.maximum(conv + pb_ref[0:1, :], 0.0)          # bias + ReLU, (M, F)

    # MaxPool2d((seq_len, 1)) + squeeze -> max over the sequence axis.
    # S=8 keeps the (M,F)<->(B,S,F) reshape (8,128)-tile aligned (free).
    pooled = jnp.max(conv.reshape(B, S, F), axis=1)          # (B, F) f32

    # TODO(synk): nn.Dropout omitted (inference/eval semantics -> identity).

    # Linear(F, 1): contract F of wd(1,F) against F of pooled(B,F) -> (1, B),
    # so the result lands lane-dense (batch on lanes) with no relayout.
    out = lax.dot_general(pb_ref[1:2, :], pooled,
                          (((1,), (1,)), ((), ())),
                          preferred_element_type=jnp.float32)
    o_ref[...] = (out + bd_ref[0, 0]).astype(o_ref.dtype)    # single (1, B) write


def cnn_forward(x, mask, wc, bc, wd, bd):
    """x: (B, S, H) f32, mask: (B, S) bool. Returns (B, 1) f32."""
    B, S, H = x.shape
    F = wc.shape[1]

    # bf16 activations + conv weight (f32 accumulation inside the kernel).
    x_bf = x.reshape(B * S, H).astype(jnp.bfloat16)
    wc_bf = wc.astype(jnp.bfloat16)
    mask_i = mask.astype(jnp.int32).reshape(B * S, 1)
    # Pack the tiny per-channel params into ONE VMEM operand (one DMA, one tile).
    pb = jnp.concatenate([bc, wd], axis=0)                   # (2, F) f32

    vmem = pltpu.MemorySpace.VMEM
    out = pl.pallas_call(
        cnn_kernel,
        out_shape=jax.ShapeDtypeStruct((1, B), jnp.float32),
        # Grid-free: every operand is a single whole-array block (B=2 is tiny).
        in_specs=[
            pl.BlockSpec(memory_space=vmem),                     # x    (M, H) bf16
            pl.BlockSpec(memory_space=vmem),                     # mask (M, 1) i32
            pl.BlockSpec(memory_space=vmem),                     # wc   (H, F) bf16
            pl.BlockSpec(memory_space=vmem),                     # pb   (2, F) f32
            pl.BlockSpec(memory_space=pltpu.MemorySpace.SMEM),   # bd   (1, 1) f32
        ],
        out_specs=pl.BlockSpec(memory_space=vmem),
    )(x_bf, mask_i, wc_bf, pb, bd)
    # Module semantics: dense output is (B, 1); (1,B)->(B,1) is a free reshape.
    return out.reshape(B, 1)


def ref_forward(x, mask, wc, bc, wd, bd):
    """Pure-JAX reference mirroring the PyTorch forward (eval mode), with the
    same bf16 cast of x/wc as the kernel."""
    xm = jnp.where(mask[:, :, None], 0.0, x).astype(jnp.bfloat16)  # masked_fill_
    conv = jnp.einsum("bsh,hf->bsf", xm, wc.astype(jnp.bfloat16),
                      preferred_element_type=jnp.float32)
    conv = jnp.maximum(conv + bc, 0.0)
    pooled = jnp.max(conv, axis=1)                                 # maxpool+squeeze
    return jnp.sum(pooled * wd, axis=-1, keepdims=True) + bd[0, 0]  # dense


if __name__ == "__main__":
    # Module hyperparams: hidden_size=32, filters=16, seq_len=8, batch=2
    B, S, H, F = 2, 8, 32, 16

    key = jax.random.PRNGKey(0)
    k1, k2, k3, k4, k5, k6 = jax.random.split(key, 6)

    x = jax.random.normal(k1, (B, S, H), dtype=jnp.float32)
    mask = jax.random.bernoulli(k2, 0.25, (B, S))                  # bool mask

    # Conv2d(1, F, (1, H)): weight (F,1,1,H) stored pre-transposed as (H, F)
    wc = jax.random.normal(k3, (H, F), dtype=jnp.float32) * 0.1
    bc = jax.random.normal(k4, (1, F), dtype=jnp.float32) * 0.1
    # Linear(F, 1): weight stored as the natural (1, F) row
    wd = jax.random.normal(k5, (1, F), dtype=jnp.float32) * 0.1
    bd = jax.random.normal(k6, (1, 1), dtype=jnp.float32) * 0.1

    out = cnn_forward(x, mask, wc, bc, wd, bd)
    out = jax.block_until_ready(out)

    ref = ref_forward(x, mask, wc, bc, wd, bd)
    assert out.shape == (B, 1), out.shape
    assert jnp.allclose(out, ref, atol=1e-3, rtol=1e-3), (out, ref)

    print("KERNEL_OK")
</pallas_src>

<mosaic_0001>
module attributes {stable_mosaic.version = 11 : i64} {
  func.func @cnn_kernel(%arg0: memref<16x32xbf16, #tpu.memory_space<vmem>>, %arg1: memref<16x1xi32, #tpu.memory_space<vmem>>, %arg2: memref<32x16xbf16, #tpu.memory_space<vmem>>, %arg3: memref<2x16xf32, #tpu.memory_space<vmem>>, %arg4: memref<1x1xf32, #tpu.memory_space<smem>>, %arg5: memref<1x2xf32, #tpu.memory_space<vmem>>) attributes {dimension_semantics = [], scalar_prefetch = 0 : i64, scratch_operands = 0 : i64, tpu.core_type = #tpu.core_type<tc>} {
    %c0 = arith.constant 0 : index
    %c0_0 = arith.constant 0 : index
    %0 = vector.load %arg0[%c0, %c0_0] : memref<16x32xbf16, #tpu.memory_space<vmem>>, vector<16x32xbf16>
    %c0_1 = arith.constant 0 : index
    %c0_2 = arith.constant 0 : index
    %1 = vector.load %arg1[%c0_1, %c0_2] : memref<16x1xi32, #tpu.memory_space<vmem>>, vector<16x1xi32>
    %c0_i32 = arith.constant 0 : i32
    %2 = vector.broadcast %c0_i32 : i32 to vector<16x1xi32>
    %3 = arith.cmpi eq, %1, %2 : vector<16x1xi32>
    %cst = arith.constant 0.000000e+00 : bf16
    %4 = vector.broadcast %cst : bf16 to vector<16x32xbf16>
    %5 = vector.shape_cast %3 : vector<16x1xi1> to vector<16x1xi1>
    %6 = vector.broadcast %5 : vector<16x1xi1> to vector<16x32xi1>
    %7 = arith.select %6, %0, %4 : vector<16x32xi1>, vector<16x32xbf16>
    %c0_3 = arith.constant 0 : index
    %c0_4 = arith.constant 0 : index
    %8 = vector.load %arg2[%c0_3, %c0_4] : memref<32x16xbf16, #tpu.memory_space<vmem>>, vector<32x16xbf16>
    %cst_5 = arith.constant dense<0.000000e+00> : vector<16x16xf32>
    %9 = tpu.matmul %7, %8, %cst_5 {dimension_numbers = #tpu.dot_dimension_numbers<[1], [0], [0], [1], [0, 0, 1, 1], [], []>} : vector<16x32xbf16>, vector<32x16xbf16>, vector<16x16xf32> -> vector<16x16xf32>
    %c0_6 = arith.constant 0 : index
    %c0_7 = arith.constant 0 : index
    %10 = vector.load %arg3[%c0_6, %c0_7] : memref<2x16xf32, #tpu.memory_space<vmem>>, vector<1x16xf32>
    %11 = vector.broadcast %10 : vector<1x16xf32> to vector<16x16xf32>
    %12 = arith.addf %9, %11 : vector<16x16xf32>
    %cst_8 = arith.constant 0.000000e+00 : f32
    %13 = vector.broadcast %cst_8 : f32 to vector<16x16xf32>
    %14 = arith.maximumf %12, %13 : vector<16x16xf32>
    %15 = vector.shape_cast %14 : vector<16x16xf32> to vector<2x8x16xf32>
    %cst_9 = arith.constant dense<0xFF800000> : vector<2x16xf32>
    %16 = vector.multi_reduction <maximumf>, %15, %cst_9 [1] : vector<2x8x16xf32> to vector<2x16xf32>
    %c1 = arith.constant 1 : index
    %c0_10 = arith.constant 0 : index
    %17 = vector.load %arg3[%c1, %c0_10] : memref<2x16xf32, #tpu.memory_space<vmem>>, vector<1x16xf32>
    %cst_11 = arith.constant dense<0.000000e+00> : vector<1x2xf32>
    %18 = tpu.matmul %17, %16, %cst_11 {dimension_numbers = #tpu.dot_dimension_numbers<[1], [1], [0], [0], [0, 0, 1, 0], [], []>} : vector<1x16xf32>, vector<2x16xf32>, vector<1x2xf32> -> vector<1x2xf32>
    %c0_12 = arith.constant 0 : index
    %c0_13 = arith.constant 0 : index
    %19 = memref.load %arg4[%c0_12, %c0_13] : memref<1x1xf32, #tpu.memory_space<smem>>
    %20 = vector.broadcast %19 : f32 to vector<1x2xf32>
    %21 = arith.addf %18, %20 : vector<1x2xf32>
    %c0_14 = arith.constant 0 : index
    %c0_15 = arith.constant 0 : index
    %22 = vector.load %arg5[%c0_14, %c0_15] : memref<1x2xf32, #tpu.memory_space<vmem>>, vector<1x2xf32>
    tpu.vector_store %arg5[%c0_14, %c0_15], %21 {strides = array<i32>} : memref<1x2xf32, #tpu.memory_space<vmem>>, vector<1x2xf32>,
    return
  }
}

</mosaic_0001>

<bundles_post_ra>
// kernel: tpu_custom_call.1
= control target key start
LH: loop header
LB: loop body
LE: loop exit
PB: predicated region body
PF: predicated region fallthrough
CT: control target
= control target key end

     0   :  { %v285_v2 = vmov 0   ;;  %s362_s0 = inlined_call_operand.vmem [shape: bf16[16,32], index: 0, kind: input, shape index: {}]   ;;  %s363_s1 = inlined_call_operand.vmem [shape: s32[16,1], index: 1, kind: input, shape index: {}]   ;;  %s364_s2 = inlined_call_operand.vmem [shape: bf16[32,16], index: 2, kind: input, shape index: {}]   ;;  %s365_s3 = inlined_call_operand.vmem [shape: f32[2,16], index: 3, kind: input, shape index: {}]   ;;  %s366_s4 = inlined_call_operand.<no memory space> [shape: f32[1,1], index: 4, kind: input, shape index: {}]   ;;  %s367_s5 = inlined_call_operand.hbm [shape: f32[1,2], index: 5, kind: output, shape index: {}]  }
   0x1   :  { %v25_v0 = vld [vmem:[%s363_s1] sm:$0xff]  ;;  %v26_v1 = vld [vmem:[%s363_s1 + $0x8] sm:$0xff]  ;;  %258 = vset.pattern.permute.xlu0 %v285_v2 }
   0x2   :  { %vm27_vm0 = vcmp.eq.s32.totalorder %v25_v0, 0  ;;  %vm28_vm1 = vcmp.eq.s32.totalorder %v26_v1, 0  ;;  %v259_v4 = vld [vmem:[%s364_s2] sm:$0xff]  }
   0x3   :  { %v29_v3 = vsel %vm27_vm0, 1, %v285_v2 }
   0x4   :  { %32 = vperm.xlu0 %258, %v29_v3  }
   0x5   :  { %11 = vsyncpa [#allocation4], 0  ;;  %v30_v5 = vsel %vm28_vm1, 1, %v285_v2  ;;  %v286_v6 = vmov 0.0   ;;  %v260_v7 = vld [vmem:[%s364_s2 + $0x8] sm:$0xff]   ;;  %vm287_vm2 = vmmov 0   ;;  %v133_v40 = vstv %s366_s4 }
   0x6   :  { %241 = vmatprep.subr.bf16.mxu0 %v286_v6  ;;  %249 = vmatprep.subr.mxu1 %v286_v6  ;;  %v23_v9 = vld [vmem:[%s362_s0] sm:$0xf]  ;;  %v24_v11 = vld [vmem:[%s362_s0 + $0x4] sm:$0xf]  ;;  %vm69_vm7 = vcmask 261120   ;;  %vm116_vm8 = vcmask 130048  }
   0x7   :  { %242 = vmatpush3.bf16.msra.mxu0 %v259_v4  ;;  %245 = vmatprep.mubr.msk.bf16.mxu0 %vm287_vm2, %v286_v6  ;;  %v229_v15 = vld [vmem:[%s365_s3] ss:$0 sm:$0xff]  ;;  %vm136_vm9 = vcmask 1041409   ;;  %v131_v39 = vld [vmem:[%s365_s3 + $0x1] sm:$0x1]  ;;  %s288_s8 = smov [#allocation3]  }
   0x8   :  { %243 = vmatprep.subr.bf16.mxu0 %v286_v6  ;;  %35 = vperm.xlu0 %258, %v30_v5   ;;  %s221_s9 = sshll.u32 %s288_s8, 4  ;;  %vm213_vm10 = vcmask 8192   ;;  %s222_s9 = int_to_ptr.vmem [resolvable:$true] %s221_s9 }
   0x9   :  { %251 = vmatprep.mubr.msk.f32.mxu1 %vm287_vm2, %v286_v6  ;;  %s261_s10 = scalar_lea.vmem %s222_s9, 16  ;;  %s265_s11 = scalar_lea.vmem %s222_s9, 32 }
   0xa   :  { %p262_p0 = scmp.ne.s32.totalorder %s222_s9, %s261_s10  ;;  %p266_p1 = scmp.lt.s32.totalorder %s222_s9, %s222_s9 }
   0xb   :  { %244 = vmatpush3.bf16.msra.mxu0 %v260_v7  ;;  %p267_p2 = scmp.lt.s32.totalorder %s265_s11, %s261_s10 }
   0xd   :  { %p268_p3 = por %p267_p2, %p266_p1 }
   0xf   :  { %p269_p4 = pnand %p268_p3, %p262_p0 }
  0x83   :  { %v33_v8 = vpop.permute.xlu0 %32 }
  0x84   :  { %vm37_vm3 = vcmp.eq.s32.totalorder %v33_v8, 1 }
  0x85   :  { %vm39_vm4 = vmpackc.low %vm37_vm3, %vm37_vm3 }
  0x86   :  { %v41_v12 = vsel %vm39_vm4, %v23_v9, 0 }
  0x87   :  { %v36_v10 = vpop.permute.xlu0 %35 }
  0x88   :  { %vm38_vm5 = vcmp.eq.s32.totalorder %v36_v10, 1 }
  0x89   :  { %vm40_vm6 = vmpackc.low %vm38_vm5, %vm38_vm5 }
  0x8a   :  { %v42_v13 = vsel %vm40_vm6, %v24_v11, 0 }
  0x8b   :  { %v230_v14 = vcombine.low %v41_v12, %v42_v13 }
  0x8d   :  { %246 = vmatmul.mubr.msk.bf16.vlgmr.msra.gmra.mrb[0].mxu0 %vm69_vm7, %v230_v14 }
 0x160   :  { %v107_v16 = vpop.f32.mrb[0].mxu0 }
 0x161   :  { %v108_v17 = vadd.f32 %v229_v15, %v107_v16  ;;  %v247_v18 = vpop.f32.mrb[1].mxu0 }
 0x162   :  { %v110_v19 = vpop.f32.mrb[2].mxu0 }
 0x163   :  { %v114_v20 = vmax.f32 %v108_v17, 0.0  ;;  %v111_v21 = vadd.f32 %v229_v15, %v110_v19  ;;  %v248_v22 = vpop.f32.mrb[3].mxu0 }
 0x165   :  { %v117_v23 = vsel %vm116_vm8, %v114_v20, -inf  ;;  %v115_v24 = vmax.f32 %v111_v21, 0.0 }
 0x166   :  { %v118_v25 = vrot.slane %v117_v23, 4 }
 0x167   :  { %v124_v26 = vsel %vm116_vm8, %v115_v24, -inf }
 0x168   :  { %v119_v27 = vmax.f32 %v117_v23, %v118_v25  ;;  %v125_v28 = vrot.slane %v124_v26, 4 }
 0x16a   :  { %v120_v29 = vrot.slane %v119_v27, 2  ;;  %v126_v30 = vmax.f32 %v124_v26, %v125_v28 }
 0x16c   :  { %v121_v31 = vmax.f32 %v119_v27, %v120_v29  ;;  %v127_v32 = vrot.slane %v126_v30, 2 }
 0x16e   :  { %v122_v33 = vrot.slane %v121_v31, 1  ;;  %v128_v34 = vmax.f32 %v126_v30, %v127_v32 }
 0x170   :  { %v129_v35 = vrot.slane %v128_v34, 1  ;;  %v123_v36 = vmax.f32 %v121_v31, %v122_v33 }
 0x172   :  { %v130_v37 = vmax.f32 %v128_v34, %v129_v35 }
 0x174   :  { %v137_v38 = vsel %vm136_vm9, %v130_v37, %v123_v36 }
 0x175   :  { %250 = vmatpush3.xpose.msk.msra.mxu1 %vm116_vm8, %v137_v38 }
 0x178   :  { %252 = vmatmul.mubr.msk.f32.vlgmr.msra.gmra.mrb[0].mxu1 %vm116_vm8, %v131_v39 }
 0x24b   :  { %v209_v41 = vpop.f32.mrb[0].mxu1 }
 0x24c   :  { %v210_v42 = vadd.f32 %v209_v41, %v133_v40  ;;  %v253_v43 = vpop.f32.mrb[1].mxu1 }
 0x24e   :  { %214 = vst.msk [vmem:[#allocation3] sm:$0x1] %vm213_vm10, %v210_v42 }
 0x24f   :  { %272 = shalt.err (!%p269_p4)
}
 0x250   :  { %s273_s4 = scalar_lea.hbm %s367_s5, 16 }
 0x251   :  { %p274_p5 = scmp.ne.s32.totalorder %s367_s5, %s273_s4  ;;  %p277_p6 = scmp.lt.u32.totalorder %s273_s4, %s367_s5 }
 0x253   :  { %p279_p7 = pnand %p277_p6, %p274_p5 }
 0x255   :  { %282 = shalt.err (!%p279_p7)
}
 0x256   :  { %224 = dma.vmem_to_hbm [thread:$0]  %s222_s9, 16, %s367_s5, [#allocation4]  }
 0x257   :  { %283 = dma.done.wait [#allocation4], 16  }
 0x258   :  { %284 = vsyncadd [#allocation4], 4294967280 }
 0x259   :  { %228 = vsyncpa [#allocation4], 1 }

</bundles_post_ra>
